<compile_context>
chip_gen: v7x
topology: tpu7x:2x2x1
jax: 0.10.0
libtpu: 0.0.40
codegen_flags: <defaults>
</compile_context>

<pallas_src>
import functools

import jax
import jax.numpy as jnp
from jax.experimental import pallas as pl
from jax.experimental.pallas import tpu as pltpu


# ----------------------------------------------------------------------------
# Kernels
# ----------------------------------------------------------------------------

def _excite(y, w1t_ref, w2t_ref, w3a_ref, w3bt_ref, snr):
    """Excitation MLP: Linear->ReLU->Linear->ReLU->Linear(+snr column)->sigmoid."""
    h = jnp.maximum(
        jnp.dot(y, w1t_ref[...], preferred_element_type=jnp.float32), 0.0)
    y2 = jnp.maximum(
        jnp.dot(h, w2t_ref[...], preferred_element_type=jnp.float32), 0.0)
    z = jnp.dot(y2, w3bt_ref[...], preferred_element_type=jnp.float32)
    z = z + snr * w3a_ref[...]
    return jax.nn.sigmoid(z)                                    # (1, c)


def _se_fused_kernel(x_ref, w1t_ref, w2t_ref, w3a_ref, w3bt_ref, snr_ref,
                     o_ref, *, inv_hw):
    # Single pass: the (1, c, hw) per-batch block is resident in VMEM, so x is
    # read from HBM exactly once and the output written once.
    xt = x_ref[...].astype(jnp.float32)                         # (1, c, hw)
    y = jnp.sum(xt, axis=-1) * inv_hw                           # (1, c)
    s = _excite(y, w1t_ref, w2t_ref, w3a_ref, w3bt_ref, snr_ref[0, 0])
    o_ref[...] = (xt * s[:, :, None]).astype(o_ref.dtype)


def _se_gate_kernel(x_ref, w1t_ref, w2t_ref, w3a_ref, w3bt_ref, snr_ref,
                    s_ref, sum_ref, *, inv_hw, hw, hw_tile, acc_lanes, ragged):
    # Pass A: tiled spatial reduction over grid axis 1, MLP epilogue at k==last.
    k = pl.program_id(1)

    @pl.when(k == 0)
    def _():
        sum_ref[...] = jnp.zeros_like(sum_ref)

    xt = x_ref[...].astype(jnp.float32)                         # (1, c, hw_tile)
    if ragged:
        # Zero the lanes of the (possibly partial) last tile that lie past hw.
        lane = jax.lax.broadcasted_iota(jnp.int32, xt.shape, 2)
        xt = jnp.where(k * hw_tile + lane < hw, xt, 0.0)

    if hw_tile == acc_lanes:
        sum_ref[...] += xt
    else:
        # Lane-preserving partial sums: (1, c, hw_tile//128, 128) -> (1, c, 128)
        # = pure VALU adds + full-width stores; no per-step cross-lane reduce.
        sum_ref[...] += jnp.sum(
            xt.reshape(xt.shape[0], xt.shape[1], hw_tile // acc_lanes, acc_lanes),
            axis=2)

    @pl.when(k == pl.num_programs(1) - 1)
    def _():
        y = jnp.sum(sum_ref[...], axis=-1) * inv_hw             # (1, c)
        s = _excite(y, w1t_ref, w2t_ref, w3a_ref, w3bt_ref, snr_ref[0, 0])
        s_ref[...] = s[:, :, None].astype(s_ref.dtype)


def _se_scale_kernel(x_ref, s_ref, o_ref):
    # Pass B: elementwise x * s; s is (1, c, 1) so the broadcast is lane-only.
    o_ref[...] = (x_ref[...] * s_ref[...]).astype(o_ref.dtype)


# ----------------------------------------------------------------------------
# Wrapper
# ----------------------------------------------------------------------------

_DEFAULT_VMEM_CAP = 64 * 1024 * 1024    # v7x per-TC VMEM (smallest generation)


def _vmem_capacity_bytes():
    try:
        info = pltpu.get_tpu_info()
        cap = getattr(info, "vmem_capacity_bytes", None)
        if cap:
            return int(cap)
    except Exception:
        pass
    return _DEFAULT_VMEM_CAP


def _round_up(v, m):
    return ((v + m - 1) // m) * m


def se_layer(x, snr, w1, w2, w3, *, hw_tile=None, force_two_pass=False):
    """x: (b, c, h, w); snr: scalar; w1: (c//r, c); w2: (c, c//r); w3: (c, c+1)."""
    b, c, h, w = x.shape
    hw = h * w
    hid = w1.shape[0]
    itemsize = jnp.dtype(x.dtype).itemsize

    x3 = x.reshape(b, c, hw)                                    # free (contiguous)
    w1t = jnp.transpose(w1).astype(jnp.float32)                 # (c, hid)
    w2t = jnp.transpose(w2).astype(jnp.float32)                 # (hid, c)
    w3a = jnp.transpose(w3[:, :1]).astype(jnp.float32)          # (1, c)  snr column
    w3bt = jnp.transpose(w3[:, 1:]).astype(jnp.float32)         # (c, c)
    snr_arr = jnp.full((1, 1), snr, dtype=jnp.float32)

    w_bytes = 4 * (w1t.size + w2t.size + w3a.size + w3bt.size)
    vmem_cap = _vmem_capacity_bytes()
    budget = vmem_cap * 3 // 4                                  # compiler headroom
    slack = 512 * 1024
    mlp_flops = 2 * b * (2 * c * hid + c * c)

    per_batch_bytes = c * hw * itemsize                         # one (1, c, hw) block

    # ------------- Fused single-pass path: x resident per batch block --------
    if (not force_two_pass and hw_tile is None
            and 4 * per_batch_bytes + w_bytes + slack <= budget):
        vmem_limit = int(min(vmem_cap,
                             max(4 * per_batch_bytes + w_bytes + 2 * slack,
                                 16 * 1024 * 1024)))
        out = pl.pallas_call(
            functools.partial(_se_fused_kernel, inv_hw=1.0 / float(hw)),
            out_shape=jax.ShapeDtypeStruct((b, c, hw), x.dtype),
            grid=(b,),
            in_specs=[
                pl.BlockSpec((1, c, hw), lambda i: (i, 0, 0)),
                pl.BlockSpec((c, hid), lambda i: (0, 0)),       # weights resident
                pl.BlockSpec((hid, c), lambda i: (0, 0)),
                pl.BlockSpec((1, c), lambda i: (0, 0)),
                pl.BlockSpec((c, c), lambda i: (0, 0)),
                pl.BlockSpec(memory_space=pltpu.MemorySpace.SMEM),
            ],
            out_specs=pl.BlockSpec((1, c, hw), lambda i: (i, 0, 0)),
            compiler_params=pltpu.CompilerParams(
                dimension_semantics=("parallel",),              # megacore over batch
                vmem_limit_bytes=vmem_limit,
            ),
            cost_estimate=pl.CostEstimate(
                flops=2 * x3.size + mlp_flops,
                transcendentals=b * c,
                bytes_accessed=2 * x3.size * itemsize + w_bytes,
            ),
        )(x3, w1t, w2t, w3a, w3bt, snr_arr)
        return out.reshape(b, c, h, w)

    # ------------- Two-pass path: tiled gate reduction + tiled scale ---------
    if hw_tile is None:
        # Size x blocks from the VMEM budget.  Pass B holds x-in + out blocks,
        # each double-buffered -> ~4x block bytes in flight (Pass A needs less).
        block_budget = max(128 * 1024, (budget - w_bytes - slack) // 4)
        hw_tile = (block_budget // (c * itemsize)) // 128 * 128
    else:
        hw_tile = _round_up(int(hw_tile), 128)
    if hw >= 128:
        hw_tile = max(128, min(hw_tile, (hw // 128) * 128))     # lane-dense, <= hw
        acc_lanes = 128
    else:
        hw_tile = hw                                            # tiny map: full dim
        acc_lanes = hw_tile

    n_hw = pl.cdiv(hw, hw_tile)
    ragged = (hw % hw_tile) != 0
    block_bytes = c * hw_tile * itemsize
    vmem_limit = int(min(vmem_cap,
                         max(4 * block_bytes + w_bytes + 2 * slack,
                             16 * 1024 * 1024)))

    # Pass A: spatial sum -> channel gate s (b, c, 1).
    gate = pl.pallas_call(
        functools.partial(_se_gate_kernel, inv_hw=1.0 / float(hw), hw=hw,
                          hw_tile=hw_tile, acc_lanes=acc_lanes, ragged=ragged),
        out_shape=jax.ShapeDtypeStruct((b, c, 1), jnp.float32),
        grid=(b, n_hw),
        in_specs=[
            pl.BlockSpec((1, c, hw_tile), lambda i, k: (i, 0, k)),
            pl.BlockSpec((c, hid), lambda i, k: (0, 0)),        # weights resident
            pl.BlockSpec((hid, c), lambda i, k: (0, 0)),
            pl.BlockSpec((1, c), lambda i, k: (0, 0)),
            pl.BlockSpec((c, c), lambda i, k: (0, 0)),
            pl.BlockSpec(memory_space=pltpu.MemorySpace.SMEM),
        ],
        out_specs=pl.BlockSpec((1, c, 1), lambda i, k: (i, 0, 0)),
        scratch_shapes=[pltpu.VMEM((1, c, acc_lanes), jnp.float32)],
        compiler_params=pltpu.CompilerParams(
            dimension_semantics=("parallel", "arbitrary"),      # batch || , hw reduce
            vmem_limit_bytes=vmem_limit,
        ),
        cost_estimate=pl.CostEstimate(
            flops=x3.size + mlp_flops,
            transcendentals=b * c,
            bytes_accessed=x3.size * itemsize + w_bytes + 4 * b * c,
        ),
    )(x3, w1t, w2t, w3a, w3bt, snr_arr)

    # Pass B: elementwise scale, lane-dense tiles, fully parallel.
    out = pl.pallas_call(
        _se_scale_kernel,
        out_shape=jax.ShapeDtypeStruct((b, c, hw), x.dtype),
        grid=(b, n_hw),
        in_specs=[
            pl.BlockSpec((1, c, hw_tile), lambda i, k: (i, 0, k)),
            pl.BlockSpec((1, c, 1), lambda i, k: (i, 0, 0)),
        ],
        out_specs=pl.BlockSpec((1, c, hw_tile), lambda i, k: (i, 0, k)),
        compiler_params=pltpu.CompilerParams(
            dimension_semantics=("parallel", "parallel"),
            vmem_limit_bytes=vmem_limit,
        ),
        cost_estimate=pl.CostEstimate(
            flops=x3.size,
            transcendentals=0,
            bytes_accessed=2 * x3.size * itemsize + 4 * b * c,
        ),
    )(x3, gate)

    return out.reshape(b, c, h, w)


# ----------------------------------------------------------------------------
# Pure-JAX reference (mirrors the PyTorch forward exactly)
# ----------------------------------------------------------------------------

def se_layer_ref(x, snr, w1, w2, w3):
    b, c, _, _ = x.shape
    y = jnp.mean(x, axis=(2, 3))                                # (b, c)
    y = jnp.maximum(y @ w1.T, 0.0)
    y = jnp.maximum(y @ w2.T, 0.0)
    snr_col = jnp.full((b, 1), snr, dtype=x.dtype)
    z = jnp.concatenate([snr_col, y], axis=1) @ w3.T
    s = jax.nn.sigmoid(z)
    return x * s[:, :, None, None]


if __name__ == "__main__":
    # Module config: channel=32, reduction=16 -> hidden = 2
    B, C, H, W = 2, 32, 16, 16
    R = 16
    HID = C // R

    key = jax.random.PRNGKey(0)
    kx, k1, k2, k3 = jax.random.split(key, 4)
    x = jax.random.normal(kx, (B, C, H, W), dtype=jnp.float32)
    # PyTorch Linear weight layout = (out, in), no bias.
    w1 = jax.random.normal(k1, (HID, C), dtype=jnp.float32) * 0.2
    w2 = jax.random.normal(k2, (C, HID), dtype=jnp.float32) * 0.2
    w3 = jax.random.normal(k3, (C, C + 1), dtype=jnp.float32) * 0.2
    snr = 10.0

    ref = se_layer_ref(x, snr, w1, w2, w3)

    # 1) Fused single-pass path (x resident in VMEM, default dispatch).
    out = jax.block_until_ready(se_layer(x, snr, w1, w2, w3))
    assert out.shape == (B, C, H, W)
    assert jnp.allclose(out, ref, atol=1e-5, rtol=1e-5), (
        f"fused max abs err = {jnp.max(jnp.abs(out - ref))}")

    # 2) Two-pass tiled path (forced) with evenly-divisible 128-lane tiles.
    out2 = jax.block_until_ready(
        se_layer(x, snr, w1, w2, w3, hw_tile=128, force_two_pass=True))
    assert jnp.allclose(out2, ref, atol=1e-5, rtol=1e-5), (
        f"two-pass max abs err = {jnp.max(jnp.abs(out2 - ref))}")

    # 3) Two-pass tiled path with a ragged (lane-masked) last tile: hw=18*18=324.
    x_r = jax.random.normal(kx, (B, C, 18, 18), dtype=jnp.float32)
    ref_r = se_layer_ref(x_r, snr, w1, w2, w3)
    out3 = jax.block_until_ready(
        se_layer(x_r, snr, w1, w2, w3, hw_tile=128, force_two_pass=True))
    assert jnp.allclose(out3, ref_r, atol=1e-5, rtol=1e-5), (
        f"ragged max abs err = {jnp.max(jnp.abs(out3 - ref_r))}")

    print("KERNEL_OK")
</pallas_src>

<mosaic_0001>
module attributes {stable_mosaic.version = 11 : i64} {
  func.func @_se_fused_kernel(%arg0: i32, %arg1: memref<1x32x256xf32, #tpu.memory_space<vmem>>, %arg2: memref<32x2xf32, #tpu.memory_space<vmem>>, %arg3: memref<2x32xf32, #tpu.memory_space<vmem>>, %arg4: memref<1x32xf32, #tpu.memory_space<vmem>>, %arg5: memref<32x32xf32, #tpu.memory_space<vmem>>, %arg6: memref<1x1xf32, #tpu.memory_space<smem>>, %arg7: memref<1x32x256xf32, #tpu.memory_space<vmem>>) attributes {dimension_semantics = [#tpu.dimension_semantics<parallel>], iteration_bounds = array<i64: 2>, scalar_prefetch = 0 : i64, scratch_operands = 0 : i64, tpu.core_type = #tpu.core_type<tc>, window_params = [{transform_indices = @transform_0, window_bounds = array<i64: 1, 32, 256>}, {pipeline_mode = #tpu.pipeline_mode<synchronous>, transform_indices = @transform_1, window_bounds = array<i64: 32, 2>}, {pipeline_mode = #tpu.pipeline_mode<synchronous>, transform_indices = @transform_2, window_bounds = array<i64: 2, 32>}, {pipeline_mode = #tpu.pipeline_mode<synchronous>, transform_indices = @transform_3, window_bounds = array<i64: 1, 32>}, {pipeline_mode = #tpu.pipeline_mode<synchronous>, transform_indices = @transform_4, window_bounds = array<i64: 32, 32>}, {transform_indices = @transform_5, window_bounds = array<i64: 1, 1>}, {transform_indices = @transform_6, window_bounds = array<i64: 1, 32, 256>}]} {
    %c0 = arith.constant 0 : index
    %c0_0 = arith.constant 0 : index
    %c0_1 = arith.constant 0 : index
    %0 = vector.load %arg1[%c0, %c0_0, %c0_1] : memref<1x32x256xf32, #tpu.memory_space<vmem>>, vector<1x32x256xf32>
    %cst = arith.constant dense<0.000000e+00> : vector<1x32xf32>
    %1 = vector.multi_reduction <add>, %0, %cst [2] : vector<1x32x256xf32> to vector<1x32xf32>
    %cst_2 = arith.constant 3.906250e-03 : f32
    %2 = vector.broadcast %cst_2 : f32 to vector<1x32xf32>
    %3 = arith.mulf %1, %2 : vector<1x32xf32>
    %c0_3 = arith.constant 0 : index
    %c0_4 = arith.constant 0 : index
    %4 = memref.load %arg6[%c0_3, %c0_4] : memref<1x1xf32, #tpu.memory_space<smem>>
    %c0_5 = arith.constant 0 : index
    %c0_6 = arith.constant 0 : index
    %5 = vector.load %arg2[%c0_5, %c0_6] : memref<32x2xf32, #tpu.memory_space<vmem>>, vector<32x2xf32>
    %cst_7 = arith.constant dense<0.000000e+00> : vector<1x2xf32>
    %6 = tpu.matmul %3, %5, %cst_7 {dimension_numbers = #tpu.dot_dimension_numbers<[1], [0], [0], [1], [0, 0, 1, 1], [], []>} : vector<1x32xf32>, vector<32x2xf32>, vector<1x2xf32> -> vector<1x2xf32>
    %cst_8 = arith.constant 0.000000e+00 : f32
    %7 = vector.broadcast %cst_8 : f32 to vector<1x2xf32>
    %8 = arith.maximumf %6, %7 : vector<1x2xf32>
    %c0_9 = arith.constant 0 : index
    %c0_10 = arith.constant 0 : index
    %9 = vector.load %arg3[%c0_9, %c0_10] : memref<2x32xf32, #tpu.memory_space<vmem>>, vector<2x32xf32>
    %cst_11 = arith.constant dense<0.000000e+00> : vector<1x32xf32>
    %10 = tpu.matmul %8, %9, %cst_11 {dimension_numbers = #tpu.dot_dimension_numbers<[1], [0], [0], [1], [0, 0, 1, 1], [], []>} : vector<1x2xf32>, vector<2x32xf32>, vector<1x32xf32> -> vector<1x32xf32>
    %cst_12 = arith.constant 0.000000e+00 : f32
    %11 = vector.broadcast %cst_12 : f32 to vector<1x32xf32>
    %12 = arith.maximumf %10, %11 : vector<1x32xf32>
    %c0_13 = arith.constant 0 : index
    %c0_14 = arith.constant 0 : index
    %13 = vector.load %arg5[%c0_13, %c0_14] : memref<32x32xf32, #tpu.memory_space<vmem>>, vector<32x32xf32>
    %cst_15 = arith.constant dense<0.000000e+00> : vector<1x32xf32>
    %14 = tpu.matmul %12, %13, %cst_15 {dimension_numbers = #tpu.dot_dimension_numbers<[1], [0], [0], [1], [0, 0, 1, 1], [], []>} : vector<1x32xf32>, vector<32x32xf32>, vector<1x32xf32> -> vector<1x32xf32>
    %c0_16 = arith.constant 0 : index
    %c0_17 = arith.constant 0 : index
    %15 = vector.load %arg4[%c0_16, %c0_17] : memref<1x32xf32, #tpu.memory_space<vmem>>, vector<1x32xf32>
    %16 = vector.broadcast %4 : f32 to vector<1x32xf32>
    %17 = arith.mulf %16, %15 : vector<1x32xf32>
    %18 = arith.addf %14, %17 : vector<1x32xf32>
    %19 = arith.negf %18 : vector<1x32xf32>
    %20 = math.exp %19 : vector<1x32xf32>
    %cst_18 = arith.constant 1.000000e+00 : f32
    %21 = vector.broadcast %cst_18 : f32 to vector<1x32xf32>
    %22 = arith.addf %21, %20 : vector<1x32xf32>
    %23 = arith.divf %21, %22 : vector<1x32xf32>
    %24 = vector.shape_cast %23 : vector<1x32xf32> to vector<1x32x1xf32>
    %25 = vector.broadcast %24 : vector<1x32x1xf32> to vector<1x32x256xf32>
    %26 = arith.mulf %0, %25 : vector<1x32x256xf32>
    %c0_19 = arith.constant 0 : index
    %c0_20 = arith.constant 0 : index
    %c0_21 = arith.constant 0 : index
    %27 = vector.load %arg7[%c0_19, %c0_20, %c0_21] : memref<1x32x256xf32, #tpu.memory_space<vmem>>, vector<1x32x256xf32>
    tpu.vector_store %arg7[%c0_19, %c0_20, %c0_21], %26 {strides = array<i32>} : memref<1x32x256xf32, #tpu.memory_space<vmem>>, vector<1x32x256xf32>,
    return
  }
  func.func @transform_0(%arg0: i32) -> (i32, i32, i32) {
    %c0_i32 = arith.constant 0 : i32
    %c0_i32_0 = arith.constant 0 : i32
    %c0_i32_1 = arith.constant 0 : i32
    return %arg0, %c0_i32, %c0_i32_0 : i32, i32, i32
  }
  func.func @transform_1(%arg0: i32) -> (i32, i32) {
    %c0_i32 = arith.constant 0 : i32
    %c0_i32_0 = arith.constant 0 : i32
    %c0_i32_1 = arith.constant 0 : i32
    return %c0_i32, %c0_i32_0 : i32, i32
  }
  func.func @transform_2(%arg0: i32) -> (i32, i32) {
    %c0_i32 = arith.constant 0 : i32
    %c0_i32_0 = arith.constant 0 : i32
    %c0_i32_1 = arith.constant 0 : i32
    return %c0_i32, %c0_i32_0 : i32, i32
  }
  func.func @transform_3(%arg0: i32) -> (i32, i32) {
    %c0_i32 = arith.constant 0 : i32
    %c0_i32_0 = arith.constant 0 : i32
    %c0_i32_1 = arith.constant 0 : i32
    return %c0_i32, %c0_i32_0 : i32, i32
  }
  func.func @transform_4(%arg0: i32) -> (i32, i32) {
    %c0_i32 = arith.constant 0 : i32
    %c0_i32_0 = arith.constant 0 : i32
    %c0_i32_1 = arith.constant 0 : i32
    return %c0_i32, %c0_i32_0 : i32, i32
  }
  func.func @transform_5(%arg0: i32) -> (i32, i32) {
    %c0_i32 = arith.constant 0 : i32
    %c0_i32_0 = arith.constant 0 : i32
    %c0_i32_1 = arith.constant 0 : i32
    return %c0_i32, %c0_i32_0 : i32, i32
  }
  func.func @transform_6(%arg0: i32) -> (i32, i32, i32) {
    %c0_i32 = arith.constant 0 : i32
    %c0_i32_0 = arith.constant 0 : i32
    %c0_i32_1 = arith.constant 0 : i32
    return %arg0, %c0_i32, %c0_i32_0 : i32, i32, i32
  }
}

</mosaic_0001>

<bundles_post_ra>
// kernel: tpu_custom_call.1
= control target key start
LH: loop header
LB: loop body
LE: loop exit
PB: predicated region body
PF: predicated region fallthrough
CT: control target
= control target key end

     0   :  { %s1207_s0 = inlined_call_operand.hbm [shape: f32[2,32,256], index: 0, kind: input, shape index: {}]   ;;  %s1208_s1 = inlined_call_operand.vmem [shape: f32[32,2], index: 1, kind: input, shape index: {}]   ;;  %s1209_s2 = inlined_call_operand.vmem [shape: f32[2,32], index: 2, kind: input, shape index: {}]   ;;  %s1210_s3 = inlined_call_operand.vmem [shape: f32[1,32], index: 3, kind: input, shape index: {}]   ;;  %s1211_s4 = inlined_call_operand.vmem [shape: f32[32,32], index: 4, kind: input, shape index: {}]   ;;  %s1212_s5 = inlined_call_operand.<no memory space> [shape: f32[1,1], index: 5, kind: input, shape index: {}]   ;;  %s1213_s6 = inlined_call_operand.hbm [shape: f32[2,32,256], index: 6, kind: output, shape index: {}]  }
   0x1   :  { %11 = sst [smem:[#allocation2]] %s1212_s5 }
   0x2   :  { %12 = vsyncpa [#allocation4], 0 }
   0x3   :  { %14 = vsyncpa [#allocation4 + $0x1], 0 }
   0x4   :  { %15 = vsyncpa [#allocation5], 0 }
   0x5   :  { %17 = vsyncpa [#allocation5 + $0x1], 0  ;;  %s967_s23 = smov 0   ;;  %s969_s24 = smov 0  }
   0x6   :  { %s971_s25 = smov 0   ;;  %s973_s26 = smov 0  }
   0x7 LB: > { %s988_s5 = sadd.s32 4294967295, %s918_s26   ;;  %s693_s27 = sadd.s32 4294967294, %s918_s26   ;;  %s918_s26 = sphi %s973_s26, %s1226_s26   ;;  %s914_s25 = sphi %s971_s25, %s1225_s25   ;;  %s910_s24 = sphi %s969_s24, %s1224_s24   ;;  %s906_s23 = sphi %s967_s23, %s1223_s23  }
   0x8   : > { %s992_s28 = sadd.s32 1, %s918_s26   ;;  %s30_s29 = sadd.s32 1, %s914_s25 }
   0x9   : > { %s27_s30 = ssub.s32 %s918_s26, %s992_s28  ;;  %p37_p0 = scmp.ne.s32.totalorder %s914_s25, %s910_s24 }
   0xa   : > { %p28_p1 = scmp.eq.s32.totalorder %s27_s30, 0  ;;  %p38_p2 = scmp.eq.s32.totalorder %s918_s26, 0 }
   0xb   : > { %p43_p3 = scmp.ne.s32.totalorder %s910_s24, %s906_s23  ;;  %p44_p4 = scmp.eq.s32.totalorder %s988_s5, 0 }
   0xc   : > { %s1004_s7 = scalar_select %p28_p1, %s914_s25, %s30_s29  }
   0xd   : > { %p1006_p5 = por %p38_p2, %p37_p0  ;;  %p1010_p6 = por %p44_p4, %p43_p3 }
   0xe   : > { %p172_p7 = scmp.eq.s32.totalorder %s988_s5, 1  ;;  %p178_p8 = scmp.eq.s32.totalorder %s693_s27, 1 }
   0xf   : > { %p777_p10 = scmp.lt.s32.totalorder %s918_s26, 2  ;;  %s213_s12 = sand.u32 1, %s914_s25  }
  0x10   : > { %p1017_p11 = por %p172_p7, %p37_p0  ;;  %p1021_p12 = por %p178_p8, %p43_p3 }
  0x11   : > { %s712_s13 = sshll.u32 %s918_s26, 10  ;;  %s696_s14 = sshll.u32 %s213_s12, 6 }
  0x12   : > { %s1217_s10 = scalar_select %p1017_p11, 1, 0 }
  0x13   : > { %s1218_s11 = scalar_select %p1021_p12, 1, 0 }
  0x14   : > { %s1030_s17 = scalar_lea.hbm %s1207_s0, %s712_s13  ;;  %s217_s18 = scalar_lea.vmem [#allocation3], %s696_s14 }
  0x15   : > { %s224_s19 = sshll.u32 %s217_s18, 4  ;;  %p1034_p13 = pnand %p777_p10, %p1006_p5  ;;  %s1038_s19 = int_to_ptr.vmem [resolvable:$true] %s224_s19 }
  0x16   : > { %s1040_s21 = scalar_lea.sflag [#allocation4], %s213_s12  ;;  %s822_s22 = scalar_lea.hbm %s1030_s17, 1024 }
  0x17   : > { %p823_p0 = scmp.ne.s32.totalorder %s1030_s17, %s822_s22  ;;  %p824_p1 = pneg %p1034_p13 }
  0x18   : > { %s827_s30 = scalar_lea.hbm %s1207_s0, 2048  ;;  %p828_p4 = scmp.lt.u32.totalorder %s1030_s17, %s1207_s0 }
  0x19   : > { %p825_p2 = pnand %p824_p1, %p823_p0  ;;  %p829_p5 = scmp.lt.u32.totalorder %s827_s30, %s822_s22 }
  0x1a   : > { %p831_p8 = scmp.lt.u32.totalorder %s822_s22, %s1030_s17 }
  0x1b   : > { %p826_p3 = pneg %p825_p2  ;;  %p830_p7 = por %p829_p5, %p828_p4 }
  0x1d   : > { %p832_p10 = por %p831_p8, %p830_p7 }
  0x1f   : > { %p833_p9 = pnand %p832_p10, %p826_p3 }
  0x21   : > { %836 = shalt.err (!%p833_p9)
}
  0x22   : > { %s837_s12 = scalar_lea.vmem %s1038_s19, 1024  ;;  %s920_s14 = smov [#allocation3]  }
  0x23   : > { %p838_p0 = scmp.ne.s32.totalorder %s1038_s19, %s837_s12  ;;  %s842_s15 = sshll.u32 %s920_s14, 4  ;;  %s843_s15 = int_to_ptr.vmem [resolvable:$false] %s842_s15 }
  0x24   : > { %s844_s16 = scalar_lea.vmem %s843_s15, 2048  ;;  %p845_p11 = scmp.lt.s32.totalorder %s1038_s19, %s843_s15 }
  0x25   : > { %p840_p2 = pnand %p838_p0, %p824_p1  ;;  %p846_p4 = scmp.lt.s32.totalorder %s844_s16, %s837_s12 }
  0x27   : > { %p841_p12 = pneg %p840_p2  ;;  %p847_p5 = por %p846_p4, %p845_p11 }
  0x29   : > { %p848_p7 = pnand %p847_p5, %p841_p12 }
  0x2b   : > { %851 = shalt.err (!%p848_p7)
}
  0x2c   : > { %s921_s18 = smov 256   ;;  %s922_s22 = smov 16  }
  0x2d   : > { %772 = dma.hbm_to_vmem [thread:$0]  (!%p1034_p13), %s1030_s17, 1024, %s1038_s19, %s1040_s21, %s921_s18, %s921_s18, %s922_s22  }
  0x2e   : > { %p699_p9 = scmp.ge.s32.totalorder %s918_s26, 1  ;;  %p232_p1 = scmp.lt.s32.totalorder %s918_s26, 3 }
  0x30   : > { %p233_p3 = pnand %p699_p9, %p232_p1 }
  0x31   : > { %s1071_s27 = sand.u32 (!%p233_p3), 1, %s910_s24  }
  0x32   : > { %236 = sbr.rel (%p233_p3) target bundleno = 1024 (0x400), region = 44  ;;  %s700_s29 = sshll.u32 (!%p233_p3), %s1071_s27, 6 }
  0x33   : > { %s239_s30 = scalar_lea.sflag (!%p233_p3), [#allocation4], %s1071_s27  ;;  %s242_s8 = scalar_lea.vmem (!%p233_p3), [#allocation3], %s700_s29 }
  0x39   : > { %897 = dma.done.wait (%p1010_p6), %s239_s30, 1024  }
  0x3a   : > { %899 = vsyncadd (%p1010_p6), %s239_s30, 4294966272  ;;  %v1081_v0 = vld [vmem:[%s242_s8] sm:$0xff]  ;;  %v1083_v1 = vld [vmem:[%s242_s8 + $0x8] sm:$0xff]  ;;  %v923_v15 = vmov 0.0|0.0   ;;  %vm924_vm0 = vmmov 0   ;;  %v925_v19 = vmov 0.0   ;;  %v304_v20 = vlaneseq }
  0x3b   : > { %v1085_v2 = vld [vmem:[%s242_s8 + $0x20] sm:$0xff]  ;;  %v279_v3 = vadd.f32 %v1083_v1, %v1081_v0  ;;  %v1089_v4 = vld [vmem:[%s242_s8 + $0x28] sm:$0xff]  ;;  %v1091_v5 = vld [vmem:[%s242_s8 + $0x10] sm:$0xff]  ;;  %753 = vmatprep.subr.bf16.mxu0 %v923_v15  ;;  %734 = vmatprep.mubr.msk.f32.mxu0 %vm924_vm0, %v925_v19  ;;  %vm315_vm1 = vcmask 130112   ;;  %vm322_vm2 = vcmask 195712   ;;  %vm329_vm3 = vcmask 261312  }
  0x3c   : > { %v1093_v6 = vld [vmem:[%s242_s8 + $0x18] sm:$0xff]  ;;  %v285_v7 = vadd.f32 %v1089_v4, %v1085_v2  ;;  %v1097_v8 = vld [vmem:[%s242_s8 + $0x30] sm:$0xff]  ;;  %v296_v12 = vld [vmem:[%s1208_s1] sm:$0xff]  ;;  %737 = vmatprep.subr.mxu1 %v925_v19  ;;  %739 = vmatprep.mubr.msk.f32.mxu1 %vm924_vm0, %v925_v19  ;;  %v305_v21 = vand.u32 127, %v304_v20  ;;  %v1119_v22 = vshrl.u32 %v304_v20, 7  ;;  %vm331_vm4 = vcmask 261120  }
  0x3d   : > { %v1099_v9 = vld [vmem:[%s242_s8 + $0x38] sm:$0xff]  ;;  %280 = vadd.xlane.f32.xlu0 %v279_v3  ;;  %v282_v10 = vadd.f32 %v1093_v6, %v1091_v5  ;;  %v297_v13 = vld [vmem:[%s1208_s1 + $0x8] sm:$0xff]  ;;  %v298_v16 = vld [vmem:[%s1208_s1 + $0x10] sm:$0xff]  ;;  %vm410_vm5 = vcmask 1041408   ;;  %vm406_vm6 = vcmask 15360   ;;  %s295_s21 = sld [smem:[#allocation2]] }
  0x3e   : > { %286 = vadd.xlane.f32.xlu1 %v285_v7  ;;  %v288_v11 = vadd.f32 %v1099_v9, %v1097_v8  ;;  %v754_v14 = vpack.c.bf16 %v297_v13, %v296_v12  ;;  %v299_v17 = vld [vmem:[%s1208_s1 + $0x18] sm:$0xff]  ;;  %v310_v23 = vadd.s32 4294967288, %v305_v21  ;;  %v317_v25 = vadd.s32 4294967280, %v305_v21  ;;  %v405_v45 = vld [vmem:[%s1209_s2] sm:$0x3]  ;;  %v486_v47 = vld [vmem:[%s1211_s4 + $0x8] sm:$0xff] }
  0x3f   : > { %v757_v18 = vpack.c.bf16 %v299_v17, %v298_v16  ;;  %v324_v26 = vadd.s32 4294967272, %v305_v21  ;;  %v308_v28 = vsub.s32 %v305_v21, %v1119_v22  ;;  %738 = vmatpush3.msk.msra.mxu1 %vm410_vm5, %v405_v45  ;;  %v485_v46 = vld [vmem:[%s1211_s4] sm:$0xff]  ;;  %v487_v52 = vld [vmem:[%s1211_s4 + $0x10] sm:$0xff]  ;;  %v488_v53 = vld [vmem:[%s1211_s4 + $0x18] sm:$0xff]  ;;  %s270_s14 = scalar_lea.vmem [#allocation6], %s700_s29  ;;  %s713_s16 = sshll.u32 %s988_s5, 10 }
  0x40   : > { %755 = vmatpush3.bf16.msra.mxu0 %v754_v14  ;;  %v313_v30 = vsub.s32 %v310_v23, %v1119_v22  ;;  %v320_v31 = vsub.s32 %v317_v25, %v1119_v22  ;;  %759 = vmatprep.subr.bf16.mxu1 %v923_v15  ;;  %v760_v49 = vpack.c.bf16 %v486_v47, %v485_v46  ;;  %v489_v58 = vld [vmem:[%s1210_s3] sm:$0x1]  ;;  %s620_s15 = sshll.u32 %s270_s14, 4  ;;  %s1161_s22 = scalar_lea.hbm %s1213_s6, %s713_s16  ;;  %s1156_s15 = int_to_ptr.vmem [resolvable:$true] %s620_s15 }
  0x41   : > { %283 = vadd.xlane.f32.xlu0 %v282_v10  ;;  %756 = vmatprep.subr.bf16.mxu0 %v923_v15  ;;  %v327_v34 = vsub.s32 %v324_v26, %v1119_v22  ;;  %v763_v54 = vpack.c.bf16 %v488_v53, %v487_v52  ;;  %s607_s5 = scalar_lea.sflag [#allocation5], %s1071_s27  ;;  %s852_s30 = scalar_lea.vmem %s1156_s15, 1024 }
  0x42   : > { %289 = vadd.xlane.f32.xlu1 %v288_v11  ;;  %v573_v11 = vsub.s32 0, %v1119_v22  ;;  %p853_p6 = scmp.ne.s32.totalorder %s1156_s15, %s852_s30  ;;  %p1220_p11 = scmp.ne.s32.totalorder %s1217_s10, 0 }
  0x43   : > { %v490_v59 = vstv %s295_s21  ;;  %s926_s8 = smov [#allocation6]  }
  0x44   : > { %758 = vmatpush3.bf16.msra.mxu0 %v757_v18  ;;  %v491_v60 = vmul.f32 %v490_v59, %v489_v58  ;;  %p854_p12 = pnand %p853_p6, %p1220_p11  ;;  %s856_s9 = sshll.u32 %s926_s8, 4  ;;  %s857_s9 = int_to_ptr.vmem [resolvable:$false] %s856_s9 }
  0x45   : > { %s858_s17 = scalar_lea.vmem %s857_s9, 2048  ;;  %p859_p8 = scmp.lt.s32.totalorder %s1156_s15, %s857_s9 }
  0x46   : > { %p855_p13 = pneg %p854_p12  ;;  %p860_p10 = scmp.lt.s32.totalorder %s858_s17, %s852_s30 }
  0x48   : > { %p861_p0 = por %p860_p10, %p859_p8 }
  0x4a   : > { %p862_p2 = pnand %p861_p0, %p855_p13 }
  0xca   : > { %v281_v24 = vpop.xlane.xlu0 %280 }
  0xcb   : > { %v287_v27 = vpop.xlane.xlu1 %286  ;;  %v291_v29 = vmul.f32 0.00390625, %v281_v24 }
  0xcc   : > { %v293_v32 = vmul.f32 0.00390625, %v287_v27 }
  0xcd   : > { %v309_v38 = vrot.slane %v291_v29, %v308_v28 }
  0xce   : > { %v284_v33 = vpop.xlane.xlu0 %283  ;;  %v321_v40 = vrot.slane %v293_v32, %v320_v31 }
  0xcf   : > { %v292_v35 = vmul.f32 0.00390625, %v284_v33  ;;  %v290_v36 = vpop.xlane.xlu1 %289 }
  0xd0   : > { %v294_v37 = vmul.f32 0.00390625, %v290_v36 }
  0xd1   : > { %v314_v39 = vrot.slane %v292_v35, %v313_v30 }
  0xd2   : > { %v328_v41 = vrot.slane %v294_v37, %v327_v34 }
  0xd3   : > { %v316_v42 = vsel %vm315_vm1, %v314_v39, %v309_v38 }
  0xd4   : > { %v323_v43 = vsel %vm322_vm2, %v321_v40, %v316_v42 }
  0xd5   : > { %v330_v44 = vsel %vm329_vm3, %v328_v41, %v323_v43 }
  0xd6   : > { %735 = vmatmul.mubr.msk.f32.vlgmr.msra.gmra.mrb[0].mxu0 %vm331_vm4, %v330_v44 }
 0x1a9   : > { %v400_v48 = vpop.f32.mrb[0].mxu0 }
 0x1aa   : > { %v404_v50 = vmax.f32 %v400_v48, 0.0  ;;  %v736_v51 = vpop.f32.mrb[1].mxu0 }
 0x1ac   : > { %740 = vmatmul.mubr.msk.f32.vlgmr.msra.gmra.mrb[0].mxu1 %vm406_vm6, %v404_v50 }
 0x1ad   : > { %761 = vmatpush3.bf16.msra.mxu1 %v760_v49  ;;  %750 = vmatprep.mubr.msk.f32.mxu1 %vm924_vm0, %v925_v19 }
 0x1ae   : > { %762 = vmatprep.subr.bf16.mxu1 %v923_v15 }
 0x1b1   : > { %764 = vmatpush3.bf16.msra.mxu1 %v763_v54 }
 0x27f   : > { %v480_v55 = vpop.f32.mrb[0].mxu1 }
 0x280   : > { %v484_v56 = vmax.f32 %v480_v55, 0.0  ;;  %v741_v57 = vpop.f32.mrb[1].mxu1 }
 0x282   : > { %751 = vmatmul.mubr.msk.f32.vlgmr.msra.gmra.mrb[2].mxu1 %vm331_vm4, %v484_v56 }
 0x355   : > { %v561_v61 = vpop.f32.mrb[2].mxu1 }
 0x356   : > { %v562_v62 = vadd.f32 %v561_v61, %v491_v60  ;;  %v752_v63 = vpop.f32.mrb[3].mxu1 }
 0x358   : > { %v706_v3 = vmul.f32 -1.442695, %v562_v62 }
 0x35a   : > { %818 = vpow2.f32 %v706_v3 }
 0x364   : > { %v819_v7 = vpop.eup %818 }
 0x365   : > { %v568_v10 = vadd.f32 1.0, %v819_v7 }
 0x367   : > { %820 = vrcp.f32 %v568_v10 }
 0x371   : > { %v821_v12 = vpop.eup %820 }
 0x372   : > { %v574_v13 = vrot.slane %v821_v12, %v573_v11 }
 0x374   : > { %580 = vbcast.lane.b32.xlu1 %v574_v13, 264  ;;  %576 = vbcast.lane.b32.xlu0 %v574_v13, 256 }
 0x378   : > { %584 = vbcast.lane.b32.xlu1 %v574_v13, 272 }
 0x37c   : > { %588 = vbcast.lane.b32.xlu1 %v574_v13, 280 }
 0x3e6   : > { %v581_v14 = vpop.permute.xlu1 %580  ;;  %v577_v15 = vpop.permute.xlu0 %576 }
 0x3e7   : > { %v592_v16 = vmul.f32 %v581_v14, %v1091_v5  ;;  %v593_v17 = vmul.f32 %v581_v14, %v1093_v6  ;;  %v590_v18 = vmul.f32 %v577_v15, %v1081_v0  ;;  %v591_v19 = vmul.f32 %v577_v15, %v1083_v1 }
 0x3e9   : > { %600 = vst [vmem:[%s270_s14 + $0x10] sm:$0xff] %v592_v16  ;;  %601 = vst [vmem:[%s270_s14 + $0x18] sm:$0xff] %v593_v17 }
 0x3ea   : > { %598 = vst [vmem:[%s270_s14] sm:$0xff] %v590_v18  ;;  %599 = vst [vmem:[%s270_s14 + $0x8] sm:$0xff] %v591_v19  ;;  %v585_v20 = vpop.permute.xlu1 %584 }
 0x3eb   : > { %v594_v21 = vmul.f32 %v585_v20, %v1085_v2  ;;  %v595_v5 = vmul.f32 %v585_v20, %v1089_v4 }
 0x3ed   : > { %602 = vst [vmem:[%s270_s14 + $0x20] sm:$0xff] %v594_v21  ;;  %603 = vst [vmem:[%s270_s14 + $0x28] sm:$0xff] %v595_v5 }
 0x3ee   : > { %v589_v0 = vpop.permute.xlu1 %588 }
 0x3ef   : > { %v596_v1 = vmul.f32 %v589_v0, %v1097_v8  ;;  %v597_v2 = vmul.f32 %v589_v0, %v1099_v9 }
 0x3f1   : > { %604 = vst [vmem:[%s270_s14 + $0x30] sm:$0xff] %v596_v1  ;;  %605 = vst [vmem:[%s270_s14 + $0x38] sm:$0xff] %v597_v2 }
 0x3f2   : > { %865 = shalt.err (!%p862_p2)
}
 0x3f3   : > { %s866_s19 = scalar_lea.hbm %s1161_s22, 1024  ;;  %s870_s13 = scalar_lea.hbm %s1213_s6, 2048 }
 0x3f4   : > { %p867_p4 = scmp.ne.s32.totalorder %s1161_s22, %s866_s19  ;;  %p871_p9 = scmp.lt.u32.totalorder %s1161_s22, %s1213_s6 }
 0x3f5   : > { %p872_p1 = scmp.lt.u32.totalorder %s870_s13, %s866_s19  ;;  %p874_p6 = scmp.lt.u32.totalorder %s866_s19, %s1161_s22 }
 0x3f6   : > { %p868_p5 = pnand %p867_p4, %p1220_p11 }
 0x3f7   : > { %p873_p3 = por %p872_p1, %p871_p9 }
 0x3f8   : > { %p869_p7 = pneg %p868_p5 }
 0x3f9   : > { %p875_p12 = por %p874_p6, %p873_p3 }
 0x3fb   : > { %p876_p13 = pnand %p875_p12, %p869_p7 }
 0x3fd   : > { %879 = shalt.err (!%p876_p13)
}
 0x3fe   : > { %s927_s16 = smov 256   ;;  %s928_s29 = smov 16  }
 0x3ff   : > { %767 = dma.vmem_to_hbm [thread:$0]  (%p1220_p11), %s1156_s15, 1024, %s1161_s22, %s607_s5, %s927_s16, %s927_s16, %s928_s29  }
 0x400 PF: > { %s635_s18 = sand.u32 1, %s906_s23   ;;  %p1221_p8 = scmp.ne.s32.totalorder %s1218_s11, 0 }
 0x401   : > { %p1222_p10 = scmp.ge.s32.totalorder %s918_s26, 2  ;;  %s636_s30 = scalar_lea.sflag [#allocation5], %s635_s18 }
 0x403   : > { %p774_p0 = pnand %p1222_p10, %p1221_p8 }
 0x405   : > { %901 = dma.done.wait (!%p774_p0), %s636_s30, 1024  }
 0x406   : > { %903 = vsyncadd (!%p774_p0), %s636_s30, 4294966272  ;;  %p20_p2 = scmp.ge.s32.totalorder %s992_s28, 4   ;;  %s1223_s23 = smov %s910_s24 }
 0x407   : > { %s1224_s24 = smov %s914_s25  ;;  %s1225_s25 = smov %s1004_s7 }
 0x408   : > { %s1226_s26 = smov %s992_s28  ;;  %22 = sbr.rel (!%p20_p2) target bundleno = 7 (0x7), region = 89 }
 0x40f   :  { %641 = vsyncpa [#allocation4], 1 }
 0x410   :  { %643 = vsyncpa [#allocation4 + $0x1], 1 }
 0x411   :  { %644 = vsyncpa [#allocation5], 1 }
 0x412   :  { %646 = vsyncpa [#allocation5 + $0x1], 1 }

</bundles_post_ra>
